<compile_context>
chip_gen: v6e
topology: v6e:2x2x1
jax: 0.10.0
libtpu: 0.0.40
codegen_flags: <defaults>
</compile_context>

<pallas_src>
import math
from functools import partial

import jax
import jax.numpy as jnp
from jax import lax
from jax.experimental import pallas as pl
from jax.experimental.pallas import tpu as pltpu


_NEG_BIG = -1e30  # finite stand-in for -inf (avoids inf-inf -> NaN in masked paths)


def _l2_normalize(x, eps=1e-12):
    # Matches torch.nn.functional.normalize(p=2, dim=1): x / max(||x||_2, eps)
    n = jnp.sqrt(jnp.sum(x * x, axis=-1, keepdims=True))
    return x * (1.0 / jnp.maximum(n, eps))


def _round_up(x, m):
    return ((x + m - 1) // m) * m


def _cross_nt_xent_kernel(zi_ref, zj_ref, ut_hbm_ref, out_ref,
                          ut_ref, zb_ref, pos_u_ref, col_se_ref, col_max_ref,
                          loss_z_ref, dma_sem,
                          *, inv_t, bsz, bsz_pad, pbsz, pbsz_pad, tb,
                          use_fixed_shift):
    i = pl.program_id(0)
    n_steps = pl.num_programs(0)
    m_pad = 2 * pbsz_pad             # lane-padded number of memory columns
    n_pad_cols = m_pad - 2 * pbsz    # zero-padding memory columns
    n_pad_rows = bsz_pad - bsz       # zero-padding current-task rows (per half)

    # ------------------------------------------------------------------ init
    @pl.when(i == 0)
    def _init():
        # Single DMA of the normalized bf16 (d, M_pad) memory operand into its
        # resident VMEM scratch (not a pipelined input -> no double buffering).
        cp = pltpu.make_async_copy(ut_hbm_ref, ut_ref, dma_sem)
        cp.start()
        cp.wait()
        # pos_u directly in lane orientation: elementwise product of the two u
        # halves, sublane-summed to (1, pbsz_pad), written to both halves.
        ui = ut_ref[:, 0:pbsz_pad].astype(jnp.float32)
        uj = ut_ref[:, pbsz_pad:2 * pbsz_pad].astype(jnp.float32)
        pu = jnp.sum(ui * uj, axis=0, keepdims=True) * inv_t
        pos_u_ref[:, 0:pbsz_pad] = pu
        pos_u_ref[:, pbsz_pad:2 * pbsz_pad] = pu
        col_se_ref[...] = jnp.zeros_like(col_se_ref)
        col_max_ref[...] = jnp.full_like(col_max_ref, _NEG_BIG)
        loss_z_ref[...] = jnp.zeros_like(loss_z_ref)

    # ------------------------------------------------- per-row-tile compute
    zi_n = _l2_normalize(zi_ref[...].astype(jnp.float32))           # (tb, d)
    zj_n = _l2_normalize(zj_ref[...].astype(jnp.float32))           # (tb, d)
    pos_z = jnp.sum(zi_n * zj_n, axis=-1, keepdims=True) * inv_t    # (tb, 1)

    # Fused (2*tb, d) bf16 LHS (1/T folded in) -> one MXU matmul against the
    # resident (d, M_pad) bf16 operand; f32 accumulation.
    zb_ref[0:tb, :] = (zi_n * inv_t).astype(jnp.bfloat16)
    zb_ref[tb:2 * tb, :] = (zj_n * inv_t).astype(jnp.bfloat16)
    neg = jnp.dot(zb_ref[...], ut_ref[...],
                  preferred_element_type=jnp.float32)               # (2tb, M_pad)

    if use_fixed_shift:
        # Fast path: fixed logsumexp shift s = 1/T (valid since |logits| <= 1/T).
        # exp(neg - s) is computed once per element and reused for the z-side
        # (row) and u-side (column) reductions.  Zero-padded rows / columns
        # contribute exact constants handled analytically.
        s = inv_t
        e = jnp.exp(neg - s)                                        # (2tb, M_pad)
        col_se_ref[...] = col_se_ref[...] + jnp.sum(e, axis=0, keepdims=True)
        rs = jnp.sum(e, axis=-1, keepdims=True) - n_pad_cols * math.exp(-s)
        rs = jnp.maximum(rs, 0.0)                                   # (2tb, 1)
        ep = jnp.exp(pos_z - s)                                     # (tb, 1)
        li = jnp.log(ep + rs[0:tb, :])
        lj = jnp.log(ep + rs[tb:2 * tb, :])
        tile_loss = (jnp.sum(li + lj, axis=0, keepdims=True)
                     - 2.0 * jnp.sum(pos_z, axis=0, keepdims=True)
                     + (2 * tb) * s)                                # (1, 1)
        loss_z_ref[...] = loss_z_ref[...] + tile_loss
    else:
        # Safe path (extreme temperatures): max-based logsumexp with explicit
        # masking of padded rows / columns.
        col_idx = lax.broadcasted_iota(jnp.int32, (1, m_pad), 1)
        col_ok = (col_idx % pbsz_pad) < pbsz
        row_idx = lax.broadcasted_iota(jnp.int32, (2 * tb, 1), 0)
        row_ok = (i * tb + (row_idx % tb)) < bsz
        negm = jnp.where(jnp.logical_and(row_ok, col_ok), neg, _NEG_BIG)

        row_max = jnp.max(negm, axis=-1, keepdims=True)             # (2tb, 1)
        row_se = jnp.sum(jnp.exp(negm - row_max), axis=-1, keepdims=True)

        def _half_ce(rm, se):
            m = jnp.maximum(rm, pos_z)
            return jnp.log(jnp.exp(pos_z - m) + se * jnp.exp(rm - m)) + m - pos_z

        li = _half_ce(row_max[0:tb, :], row_se[0:tb, :])
        lj = _half_ce(row_max[tb:2 * tb, :], row_se[tb:2 * tb, :])
        loss_z_ref[...] = loss_z_ref[...] + jnp.sum(li + lj, axis=0, keepdims=True)

        blk_max = jnp.max(negm, axis=0, keepdims=True)              # (1, M_pad)
        new_max = jnp.maximum(col_max_ref[...], blk_max)
        col_se_ref[...] = (col_se_ref[...] * jnp.exp(col_max_ref[...] - new_max)
                           + jnp.sum(jnp.exp(negm - new_max), axis=0, keepdims=True))
        col_max_ref[...] = new_max

    # -------------------------------------------------------------- finalize
    @pl.when(i == n_steps - 1)
    def _finalize():
        col_idx = lax.broadcasted_iota(jnp.int32, (1, m_pad), 1)
        col_ok = (col_idx % pbsz_pad) < pbsz
        pos_u = pos_u_ref[...]                                       # (1, M_pad)
        if use_fixed_shift:
            s = inv_t
            # Remove the padded-row contributions (exact constants).
            cs = col_se_ref[...] - (2 * n_pad_rows) * math.exp(-s)
            cs = jnp.maximum(cs, 0.0)
            lse_u = jnp.log(jnp.exp(pos_u - s) + cs) + s
            loss_z = loss_z_ref[...] - (2.0 * n_pad_rows) * math.log(1.0 + 2 * pbsz)
        else:
            m = jnp.maximum(col_max_ref[...], pos_u)
            lse_u = jnp.log(jnp.exp(pos_u - m)
                            + col_se_ref[...] * jnp.exp(col_max_ref[...] - m)) + m
            loss_z = loss_z_ref[...]
        loss_uz = jnp.sum(jnp.where(col_ok, lse_u - pos_u, 0.0),
                          axis=-1, keepdims=True)                    # (1, 1)
        out_ref[...] = 0.5 * (loss_z * (1.0 / (2 * bsz))
                              + loss_uz * (1.0 / (2 * pbsz)))


def cross_nt_xent(z_i, z_j, u_i, u_j, temperature=0.1, *, block_rows=None):
    bsz, d = z_i.shape
    pbsz = u_i.shape[0]
    assert z_j.shape == (bsz, d)
    assert u_i.shape == (pbsz, d) and u_j.shape == (pbsz, d)

    inv_t = 1.0 / float(temperature)
    # Fixed-shift (single-exp) math is safe while |logits| <= 1/T is moderate;
    # for extreme temperatures fall back to the max-based online path.
    use_fixed_shift = inv_t <= 30.0

    # --- memory-side operand: normalized, bf16, (d, M_pad) with each half
    #     lane-padded to a multiple of 128.  Concat / pad / transpose are pure
    #     layout plumbing; the one-shot O(M*d) normalize here keeps any f32
    #     copy of u out of resident VMEM.
    pbsz_pad = _round_up(pbsz, 128)
    m_pad = 2 * pbsz_pad
    ui_n = _l2_normalize(u_i.astype(jnp.float32))
    uj_n = _l2_normalize(u_j.astype(jnp.float32))
    u_all = jnp.zeros((m_pad, d), jnp.float32)
    u_all = u_all.at[0:pbsz, :].set(ui_n)
    u_all = u_all.at[pbsz_pad:pbsz_pad + pbsz, :].set(uj_n)
    ut = jnp.transpose(u_all).astype(jnp.bfloat16)                   # (d, M_pad)

    # --- per-generation VMEM budget & row-tile selection --------------------
    vmem_cap = 64 * 1024 * 1024
    try:
        vmem_cap = int(getattr(pltpu.get_tpu_info(), "vmem_capacity_bytes",
                               vmem_cap)) or vmem_cap
    except Exception:
        pass
    budget = max(vmem_cap - max(16 * 1024 * 1024, vmem_cap // 8), 32 * 1024 * 1024)

    temps_factor = 20 if use_fixed_shift else 30
    resident = (2 * d * m_pad           # resident bf16 (d, M_pad) u operand
                + 16 * m_pad            # pos_u / col_se / col_max + slack
                + 4 * d * m_pad         # init-time f32 temporaries (pos_u)
                + 4096)

    def _bytes_for(t):
        return (resident
                + 16 * t * d            # z_i / z_j f32 tiles, double-buffered
                + 4 * t * d             # fused bf16 LHS scratch
                + temps_factor * t * m_pad)  # (2t, M_pad) f32 logits/exp temps

    if block_rows is not None:
        tb = int(block_rows)
    else:
        cands = [c for c in (1024, 512, 256, 128, 64, 32, 16, 8)
                 if c <= _round_up(bsz, 8)] or [_round_up(bsz, 8)]
        div_fit = [c for c in cands if bsz % c == 0 and _bytes_for(c) <= budget]
        any_fit = [c for c in cands if _bytes_for(c) <= budget]
        tb = div_fit[0] if div_fit else (any_fit[0] if any_fit else cands[-1])

    n_steps = -(-bsz // tb)              # cdiv
    bsz_pad = n_steps * tb
    if bsz_pad != bsz:
        zi_in = jnp.zeros((bsz_pad, d), z_i.dtype).at[0:bsz, :].set(z_i)
        zj_in = jnp.zeros((bsz_pad, d), z_j.dtype).at[0:bsz, :].set(z_j)
    else:
        zi_in, zj_in = z_i, z_j

    kernel = partial(_cross_nt_xent_kernel,
                     inv_t=inv_t, bsz=bsz, bsz_pad=bsz_pad,
                     pbsz=pbsz, pbsz_pad=pbsz_pad, tb=tb,
                     use_fixed_shift=use_fixed_shift)

    out = pl.pallas_call(
        kernel,
        out_shape=jax.ShapeDtypeStruct((1, 1), jnp.float32),
        grid_spec=pltpu.PrefetchScalarGridSpec(
            num_scalar_prefetch=0,
            grid=(n_steps,),
            in_specs=[
                pl.BlockSpec((tb, d), lambda i: (i, 0)),     # z_i row tile
                pl.BlockSpec((tb, d), lambda i: (i, 0)),     # z_j row tile
                pl.BlockSpec(memory_space=pl.ANY),           # uT: raw HBM ref
            ],
            out_specs=pl.BlockSpec((1, 1), lambda i: (0, 0)),
            scratch_shapes=[
                pltpu.VMEM((d, m_pad), jnp.bfloat16),   # resident normalized uT
                pltpu.VMEM((2 * tb, d), jnp.bfloat16),  # fused bf16 z LHS
                pltpu.VMEM((1, m_pad), jnp.float32),    # pos_u (lane oriented)
                pltpu.VMEM((1, m_pad), jnp.float32),    # column sum-exp accumulator
                pltpu.VMEM((1, m_pad), jnp.float32),    # column max (safe path)
                pltpu.VMEM((1, 1), jnp.float32),        # z-side loss accumulator
                pltpu.SemaphoreType.DMA(()),            # semaphore for the u DMA
            ],
        ),
        compiler_params=pltpu.CompilerParams(
            # The single row-tile axis carries the u-side accumulators, so it is
            # a sequential ("arbitrary") axis.
            dimension_semantics=("arbitrary",),
            vmem_limit_bytes=int(budget),
        ),
    )(zi_in, zj_in, ut)
    return out[0, 0]


def cross_nt_xent_ref(z_i, z_j, u_i, u_j, temperature=0.1):
    """Pure-JAX f32 reference mirroring the PyTorch module."""
    z_i, z_j = _l2_normalize(z_i), _l2_normalize(z_j)
    u_i, u_j = _l2_normalize(u_i), _l2_normalize(u_j)
    N = 2 * z_i.shape[0]
    M = 2 * u_i.shape[0]
    z = jnp.concatenate([z_i, z_j], axis=0)
    u = jnp.concatenate([u_i, u_j], axis=0)
    neg = z @ u.T
    pos_z = jnp.tile(jnp.sum(z_i * z_j, axis=-1), 2).reshape(N, 1)
    logits_z = jnp.concatenate([pos_z, neg], axis=1) / temperature
    loss_zu = jnp.sum(jax.nn.logsumexp(logits_z, axis=-1) - logits_z[:, 0]) / N
    pos_u = jnp.tile(jnp.sum(u_i * u_j, axis=-1), 2).reshape(M, 1)
    logits_u = jnp.concatenate([pos_u, neg.T], axis=1) / temperature
    loss_uz = jnp.sum(jax.nn.logsumexp(logits_u, axis=-1) - logits_u[:, 0]) / M
    return 0.5 * (loss_zu + loss_uz)


def _check(bsz, p, d, seed, temperature=0.1, **kw):
    key = jax.random.PRNGKey(seed)
    k1, k2, k3, k4 = jax.random.split(key, 4)
    z_i = jax.random.normal(k1, (bsz, d), dtype=jnp.float32)
    z_j = jax.random.normal(k2, (bsz, d), dtype=jnp.float32)
    u_i = jax.random.normal(k3, (p * bsz, d), dtype=jnp.float32)
    u_j = jax.random.normal(k4, (p * bsz, d), dtype=jnp.float32)

    loss = jax.block_until_ready(cross_nt_xent(z_i, z_j, u_i, u_j, temperature, **kw))
    ref = jax.block_until_ready(cross_nt_xent_ref(z_i, z_j, u_i, u_j, temperature))

    assert jnp.isfinite(loss), "kernel produced non-finite loss"
    # Tolerance reflects bf16 MXU operands (f32 accumulation / f32 softmax math).
    tol = 2e-2 * max(1.0, abs(float(ref)))
    assert abs(float(loss) - float(ref)) < tol, (float(loss), float(ref))


if __name__ == "__main__":
    # Small, module-consistent shapes: bsz current-task samples, p = memory
    # multiplier, hidden dim d.
    _check(bsz=8, p=2, d=32, seed=0)                    # single step, fast path
    _check(bsz=16, p=2, d=32, seed=1, block_rows=8)     # 2 steps: online column sums
    _check(bsz=12, p=2, d=32, seed=2, block_rows=8)     # 2 steps + padded rows
    _check(bsz=8, p=2, d=32, seed=3, temperature=0.01)  # max-based safe path
    print("KERNEL_OK")
</pallas_src>

<mosaic_0001>
module attributes {stable_mosaic.version = 11 : i64} {
  func.func @_cross_nt_xent_kernel(%arg0: i32, %arg1: memref<8x32xf32, #tpu.memory_space<vmem>>, %arg2: memref<8x32xf32, #tpu.memory_space<vmem>>, %arg3: memref<32x256xbf16, #tpu.memory_space<any>>, %arg4: memref<1x1xf32, #tpu.memory_space<vmem>>, %arg5: memref<32x256xbf16, #tpu.memory_space<vmem>>, %arg6: memref<16x32xbf16, #tpu.memory_space<vmem>>, %arg7: memref<1x256xf32, #tpu.memory_space<vmem>>, %arg8: memref<1x256xf32, #tpu.memory_space<vmem>>, %arg9: memref<1x256xf32, #tpu.memory_space<vmem>>, %arg10: memref<1x1xf32, #tpu.memory_space<vmem>>, %arg11: memref<!tpu.dma_semaphore, #tpu.memory_space<semaphore_mem>>) attributes {dimension_semantics = [#tpu.dimension_semantics<arbitrary>], iteration_bounds = array<i64: 1>, scalar_prefetch = 0 : i64, scratch_operands = 7 : i64, tpu.core_type = #tpu.core_type<tc>, window_params = [{transform_indices = @transform_0, window_bounds = array<i64: 8, 32>}, {transform_indices = @transform_1, window_bounds = array<i64: 8, 32>}, {}, {pipeline_mode = #tpu.pipeline_mode<synchronous>, transform_indices = @transform_3, window_bounds = array<i64: 1, 1>}]} {
    %c0_i32 = arith.constant 0 : i32
    %0 = arith.cmpi eq, %arg0, %c0_i32 : i32
    %1 = arith.extui %0 : i1 to i32
    %c0_i32_0 = arith.constant 0 : i32
    %2 = arith.cmpi ne, %1, %c0_i32_0 : i32
    scf.if %2 {
      tpu.enqueue_dma source(%arg3 : memref<32x256xbf16, #tpu.memory_space<any>>) target(%arg5 : memref<32x256xbf16, #tpu.memory_space<vmem>>) target_semaphore(%arg11 : memref<!tpu.dma_semaphore, #tpu.memory_space<semaphore_mem>>)
      tpu.wait_dma2 semaphore(%arg11 : memref<!tpu.dma_semaphore, #tpu.memory_space<semaphore_mem>>) src(%arg3 : memref<32x256xbf16, #tpu.memory_space<any>>) dst(%arg5 : memref<32x256xbf16, #tpu.memory_space<vmem>>)
      %c0_41 = arith.constant 0 : index
      %c0_42 = arith.constant 0 : index
      %80 = vector.load %arg5[%c0_41, %c0_42] : memref<32x256xbf16, #tpu.memory_space<vmem>>, vector<32x128xbf16>
      %81 = arith.extf %80 : vector<32x128xbf16> to vector<32x128xf32>
      %c0_43 = arith.constant 0 : index
      %c128 = arith.constant 128 : index
      %82 = vector.load %arg5[%c0_43, %c128] : memref<32x256xbf16, #tpu.memory_space<vmem>>, vector<32x128xbf16>
      %83 = arith.extf %82 : vector<32x128xbf16> to vector<32x128xf32>
      %84 = arith.mulf %81, %83 : vector<32x128xf32>
      %cst_44 = arith.constant dense<0.000000e+00> : vector<128xf32>
      %85 = vector.multi_reduction <add>, %84, %cst_44 [0] : vector<32x128xf32> to vector<128xf32>
      %86 = vector.shape_cast %85 : vector<128xf32> to vector<1x128xf32>
      %cst_45 = arith.constant 1.000000e+01 : f32
      %87 = vector.broadcast %cst_45 : f32 to vector<1x128xf32>
      %88 = arith.mulf %86, %87 : vector<1x128xf32>
      %c0_46 = arith.constant 0 : index
      %c0_47 = arith.constant 0 : index
      %89 = vector.load %arg7[%c0_46, %c0_47] : memref<1x256xf32, #tpu.memory_space<vmem>>, vector<1x128xf32>
      tpu.vector_store %arg7[%c0_46, %c0_47], %88 {strides = array<i32>} : memref<1x256xf32, #tpu.memory_space<vmem>>, vector<1x128xf32>,
      %c0_48 = arith.constant 0 : index
      %c128_49 = arith.constant 128 : index
      %90 = vector.load %arg7[%c0_48, %c128_49] : memref<1x256xf32, #tpu.memory_space<vmem>>, vector<1x128xf32>
      tpu.vector_store %arg7[%c0_48, %c128_49], %88 {strides = array<i32>} : memref<1x256xf32, #tpu.memory_space<vmem>>, vector<1x128xf32>,
      %cst_50 = arith.constant 0.000000e+00 : f32
      %91 = vector.broadcast %cst_50 : f32 to vector<1x256xf32>
      %c0_51 = arith.constant 0 : index
      %c0_52 = arith.constant 0 : index
      %92 = vector.load %arg8[%c0_51, %c0_52] : memref<1x256xf32, #tpu.memory_space<vmem>>, vector<1x256xf32>
      tpu.vector_store %arg8[%c0_51, %c0_52], %91 {strides = array<i32>} : memref<1x256xf32, #tpu.memory_space<vmem>>, vector<1x256xf32>,
      %cst_53 = arith.constant -1.000000e+30 : f32
      %93 = vector.broadcast %cst_53 : f32 to vector<1x256xf32>
      %c0_54 = arith.constant 0 : index
      %c0_55 = arith.constant 0 : index
      %94 = vector.load %arg9[%c0_54, %c0_55] : memref<1x256xf32, #tpu.memory_space<vmem>>, vector<1x256xf32>
      tpu.vector_store %arg9[%c0_54, %c0_55], %93 {strides = array<i32>} : memref<1x256xf32, #tpu.memory_space<vmem>>, vector<1x256xf32>,
      %cst_56 = arith.constant 0.000000e+00 : f32
      %95 = vector.broadcast %cst_56 : f32 to vector<1x1xf32>
      %c0_57 = arith.constant 0 : index
      %c0_58 = arith.constant 0 : index
      %96 = vector.load %arg10[%c0_57, %c0_58] : memref<1x1xf32, #tpu.memory_space<vmem>>, vector<1x1xf32>
      tpu.vector_store %arg10[%c0_57, %c0_58], %95 {strides = array<i32>} : memref<1x1xf32, #tpu.memory_space<vmem>>, vector<1x1xf32>,
    } else {
    }
    %c0 = arith.constant 0 : index
    %c0_1 = arith.constant 0 : index
    %3 = vector.load %arg1[%c0, %c0_1] : memref<8x32xf32, #tpu.memory_space<vmem>>, vector<8x32xf32>
    %4 = arith.mulf %3, %3 : vector<8x32xf32>
    %cst = arith.constant dense<0.000000e+00> : vector<8xf32>
    %5 = vector.multi_reduction <add>, %4, %cst [1] : vector<8x32xf32> to vector<8xf32>
    %6 = vector.shape_cast %5 : vector<8xf32> to vector<8x1xf32>
    %7 = math.sqrt %6 : vector<8x1xf32>
    %cst_2 = arith.constant 9.99999996E-13 : f32
    %8 = vector.broadcast %cst_2 : f32 to vector<8x1xf32>
    %9 = arith.maximumf %7, %8 : vector<8x1xf32>
    %cst_3 = arith.constant 1.000000e+00 : f32
    %10 = vector.broadcast %cst_3 : f32 to vector<8x1xf32>
    %11 = arith.divf %10, %9 : vector<8x1xf32>
    %12 = vector.broadcast %11 : vector<8x1xf32> to vector<8x32xf32>
    %13 = arith.mulf %3, %12 : vector<8x32xf32>
    %c0_4 = arith.constant 0 : index
    %c0_5 = arith.constant 0 : index
    %14 = vector.load %arg2[%c0_4, %c0_5] : memref<8x32xf32, #tpu.memory_space<vmem>>, vector<8x32xf32>
    %15 = arith.mulf %14, %14 : vector<8x32xf32>
    %cst_6 = arith.constant dense<0.000000e+00> : vector<8xf32>
    %16 = vector.multi_reduction <add>, %15, %cst_6 [1] : vector<8x32xf32> to vector<8xf32>
    %17 = vector.shape_cast %16 : vector<8xf32> to vector<8x1xf32>
    %18 = math.sqrt %17 : vector<8x1xf32>
    %cst_7 = arith.constant 9.99999996E-13 : f32
    %19 = vector.broadcast %cst_7 : f32 to vector<8x1xf32>
    %20 = arith.maximumf %18, %19 : vector<8x1xf32>
    %cst_8 = arith.constant 1.000000e+00 : f32
    %21 = vector.broadcast %cst_8 : f32 to vector<8x1xf32>
    %22 = arith.divf %21, %20 : vector<8x1xf32>
    %23 = vector.broadcast %22 : vector<8x1xf32> to vector<8x32xf32>
    %24 = arith.mulf %14, %23 : vector<8x32xf32>
    %25 = arith.mulf %13, %24 : vector<8x32xf32>
    %cst_9 = arith.constant dense<0.000000e+00> : vector<8xf32>
    %26 = vector.multi_reduction <add>, %25, %cst_9 [1] : vector<8x32xf32> to vector<8xf32>
    %27 = vector.shape_cast %26 : vector<8xf32> to vector<8x1xf32>
    %cst_10 = arith.constant 1.000000e+01 : f32
    %28 = vector.broadcast %cst_10 : f32 to vector<8x1xf32>
    %29 = arith.mulf %27, %28 : vector<8x1xf32>
    %cst_11 = arith.constant 1.000000e+01 : f32
    %30 = vector.broadcast %cst_11 : f32 to vector<8x32xf32>
    %31 = arith.mulf %13, %30 : vector<8x32xf32>
    %32 = arith.truncf %31 : vector<8x32xf32> to vector<8x32xbf16>
    %c0_12 = arith.constant 0 : index
    %c0_13 = arith.constant 0 : index
    %33 = vector.load %arg6[%c0_12, %c0_13] : memref<16x32xbf16, #tpu.memory_space<vmem>>, vector<8x32xbf16>
    tpu.vector_store %arg6[%c0_12, %c0_13], %32 {strides = array<i32>} : memref<16x32xbf16, #tpu.memory_space<vmem>>, vector<8x32xbf16>,
    %cst_14 = arith.constant 1.000000e+01 : f32
    %34 = vector.broadcast %cst_14 : f32 to vector<8x32xf32>
    %35 = arith.mulf %24, %34 : vector<8x32xf32>
    %36 = arith.truncf %35 : vector<8x32xf32> to vector<8x32xbf16>
    %c8 = arith.constant 8 : index
    %c0_15 = arith.constant 0 : index
    %37 = vector.load %arg6[%c8, %c0_15] : memref<16x32xbf16, #tpu.memory_space<vmem>>, vector<8x32xbf16>
    tpu.vector_store %arg6[%c8, %c0_15], %36 {strides = array<i32>} : memref<16x32xbf16, #tpu.memory_space<vmem>>, vector<8x32xbf16>,
    %c0_16 = arith.constant 0 : index
    %c0_17 = arith.constant 0 : index
    %38 = vector.load %arg6[%c0_16, %c0_17] : memref<16x32xbf16, #tpu.memory_space<vmem>>, vector<16x32xbf16>
    %c0_18 = arith.constant 0 : index
    %c0_19 = arith.constant 0 : index
    %39 = vector.load %arg5[%c0_18, %c0_19] : memref<32x256xbf16, #tpu.memory_space<vmem>>, vector<32x256xbf16>
    %cst_20 = arith.constant dense<0.000000e+00> : vector<16x256xf32>
    %40 = tpu.matmul %38, %39, %cst_20 {dimension_numbers = #tpu.dot_dimension_numbers<[1], [0], [0], [1], [0, 0, 1, 1], [], []>} : vector<16x32xbf16>, vector<32x256xbf16>, vector<16x256xf32> -> vector<16x256xf32>
    %cst_21 = arith.constant 1.000000e+01 : f32
    %41 = vector.broadcast %cst_21 : f32 to vector<16x256xf32>
    %42 = arith.subf %40, %41 : vector<16x256xf32>
    %43 = math.exp %42 : vector<16x256xf32>
    %c0_22 = arith.constant 0 : index
    %c0_23 = arith.constant 0 : index
    %44 = vector.load %arg8[%c0_22, %c0_23] : memref<1x256xf32, #tpu.memory_space<vmem>>, vector<1x256xf32>
    %cst_24 = arith.constant dense<0.000000e+00> : vector<256xf32>
    %45 = vector.multi_reduction <add>, %43, %cst_24 [0] : vector<16x256xf32> to vector<256xf32>
    %46 = vector.shape_cast %45 : vector<256xf32> to vector<1x256xf32>
    %47 = arith.addf %44, %46 : vector<1x256xf32>
    %c0_25 = arith.constant 0 : index
    %c0_26 = arith.constant 0 : index
    %48 = vector.load %arg8[%c0_25, %c0_26] : memref<1x256xf32, #tpu.memory_space<vmem>>, vector<1x256xf32>
    tpu.vector_store %arg8[%c0_25, %c0_26], %47 {strides = array<i32>} : memref<1x256xf32, #tpu.memory_space<vmem>>, vector<1x256xf32>,
    %cst_27 = arith.constant dense<0.000000e+00> : vector<16xf32>
    %49 = vector.multi_reduction <add>, %43, %cst_27 [1] : vector<16x256xf32> to vector<16xf32>
    %50 = vector.shape_cast %49 : vector<16xf32> to vector<16x1xf32>
    %cst_28 = arith.constant 0.0101695843 : f32
    %51 = vector.broadcast %cst_28 : f32 to vector<16x1xf32>
    %52 = arith.subf %50, %51 : vector<16x1xf32>
    %cst_29 = arith.constant 0.000000e+00 : f32
    %53 = vector.broadcast %cst_29 : f32 to vector<16x1xf32>
    %54 = arith.maximumf %52, %53 : vector<16x1xf32>
    %cst_30 = arith.constant 1.000000e+01 : f32
    %55 = vector.broadcast %cst_30 : f32 to vector<8x1xf32>
    %56 = arith.subf %29, %55 : vector<8x1xf32>
    %57 = math.exp %56 : vector<8x1xf32>
    %58 = vector.extract_strided_slice %54 {offsets = [0, 0], sizes = [8, 1], strides = [1, 1]} : vector<16x1xf32> to vector<8x1xf32>
    %59 = arith.addf %57, %58 : vector<8x1xf32>
    %60 = math.log %59 : vector<8x1xf32>
    %61 = vector.extract_strided_slice %54 {offsets = [8, 0], sizes = [8, 1], strides = [1, 1]} : vector<16x1xf32> to vector<8x1xf32>
    %62 = arith.addf %57, %61 : vector<8x1xf32>
    %63 = math.log %62 : vector<8x1xf32>
    %64 = arith.addf %60, %63 : vector<8x1xf32>
    %cst_31 = arith.constant dense<0.000000e+00> : vector<1xf32>
    %65 = vector.multi_reduction <add>, %64, %cst_31 [0] : vector<8x1xf32> to vector<1xf32>
    %66 = vector.shape_cast %65 : vector<1xf32> to vector<1x1xf32>
    %cst_32 = arith.constant dense<0.000000e+00> : vector<1xf32>
    %67 = vector.multi_reduction <add>, %29, %cst_32 [0] : vector<8x1xf32> to vector<1xf32>
    %68 = vector.shape_cast %67 : vector<1xf32> to vector<1x1xf32>
    %cst_33 = arith.constant 2.000000e+00 : f32
    %69 = vector.broadcast %cst_33 : f32 to vector<1x1xf32>
    %70 = arith.mulf %69, %68 : vector<1x1xf32>
    %71 = arith.subf %66, %70 : vector<1x1xf32>
    %cst_34 = arith.constant 1.600000e+02 : f32
    %72 = vector.broadcast %cst_34 : f32 to vector<1x1xf32>
    %73 = arith.addf %71, %72 : vector<1x1xf32>
    %c0_35 = arith.constant 0 : index
    %c0_36 = arith.constant 0 : index
    %74 = vector.load %arg10[%c0_35, %c0_36] : memref<1x1xf32, #tpu.memory_space<vmem>>, vector<1x1xf32>
    %75 = arith.addf %74, %73 : vector<1x1xf32>
    %c0_37 = arith.constant 0 : index
    %c0_38 = arith.constant 0 : index
    %76 = vector.load %arg10[%c0_37, %c0_38] : memref<1x1xf32, #tpu.memory_space<vmem>>, vector<1x1xf32>
    tpu.vector_store %arg10[%c0_37, %c0_38], %75 {strides = array<i32>} : memref<1x1xf32, #tpu.memory_space<vmem>>, vector<1x1xf32>,
    %c0_i32_39 = arith.constant 0 : i32
    %77 = arith.cmpi eq, %arg0, %c0_i32_39 : i32
    %78 = arith.extui %77 : i1 to i32
    %c0_i32_40 = arith.constant 0 : i32
    %79 = arith.cmpi ne, %78, %c0_i32_40 : i32
    scf.if %79 {
      %80 = tpu.iota {dimensions = array<i32: 1>} : vector<1x256xi32>
      %c128_i32 = arith.constant 128 : i32
      %c0_i32_41 = arith.constant 0 : i32
      %81 = arith.cmpi eq, %c128_i32, %c0_i32_41 : i32
      %c1_i32 = arith.constant 1 : i32
      %82 = arith.select %81, %c1_i32, %c128_i32 : i32
      %83 = vector.broadcast %82 : i32 to vector<1x256xi32>
      %84 = arith.remsi %80, %83 : vector<1x256xi32>
      %c0_i32_42 = arith.constant 0 : i32
      %85 = vector.broadcast %c0_i32_42 : i32 to vector<1x256xi32>
      %86 = arith.cmpi ne, %84, %85 : vector<1x256xi32>
      %c0_i32_43 = arith.constant 0 : i32
      %87 = vector.broadcast %c0_i32_43 : i32 to vector<1x256xi32>
      %88 = arith.cmpi slt, %84, %87 : vector<1x256xi32>
      %c0_i32_44 = arith.constant 0 : i32
      %89 = arith.cmpi slt, %82, %c0_i32_44 : i32
      %90 = vector.broadcast %89 : i1 to vector<1x256xi1>
      %91 = vector.broadcast %90 : vector<1x256xi1> to vector<1x256xi1>
      %92 = arith.xori %88, %91 : vector<1x256xi1>
      %93 = arith.andi %92, %86 : vector<1x256xi1>
      %94 = vector.broadcast %82 : i32 to vector<1x256xi32>
      %95 = arith.addi %84, %94 : vector<1x256xi32>
      %96 = arith.select %93, %95, %84 : vector<1x256xi1>, vector<1x256xi32>
      %c16_i32 = arith.constant 16 : i32
      %97 = vector.broadcast %c16_i32 : i32 to vector<1x256xi32>
      %98 = arith.cmpi slt, %96, %97 : vector<1x256xi32>
      %c0_45 = arith.constant 0 : index
      %c0_46 = arith.constant 0 : index
      %99 = vector.load %arg7[%c0_45, %c0_46] : memref<1x256xf32, #tpu.memory_space<vmem>>, vector<1x256xf32>
      %c0_47 = arith.constant 0 : index
      %c0_48 = arith.constant 0 : index
      %100 = vector.load %arg8[%c0_47, %c0_48] : memref<1x256xf32, #tpu.memory_space<vmem>>, vector<1x256xf32>
      %cst_49 = arith.constant 0.000000e+00 : f32
      %101 = vector.broadcast %cst_49 : f32 to vector<1x256xf32>
      %102 = arith.subf %100, %101 : vector<1x256xf32>
      %cst_50 = arith.constant 0.000000e+00 : f32
      %103 = vector.broadcast %cst_50 : f32 to vector<1x256xf32>
      %104 = arith.maximumf %102, %103 : vector<1x256xf32>
      %cst_51 = arith.constant 1.000000e+01 : f32
      %105 = vector.broadcast %cst_51 : f32 to vector<1x256xf32>
      %106 = arith.subf %99, %105 : vector<1x256xf32>
      %107 = math.exp %106 : vector<1x256xf32>
      %108 = arith.addf %107, %104 : vector<1x256xf32>
      %109 = math.log %108 : vector<1x256xf32>
      %cst_52 = arith.constant 1.000000e+01 : f32
      %110 = vector.broadcast %cst_52 : f32 to vector<1x256xf32>
      %111 = arith.addf %109, %110 : vector<1x256xf32>
      %c0_53 = arith.constant 0 : index
      %c0_54 = arith.constant 0 : index
      %112 = vector.load %arg10[%c0_53, %c0_54] : memref<1x1xf32, #tpu.memory_space<vmem>>, vector<1x1xf32>
      %cst_55 = arith.constant 0.000000e+00 : f32
      %113 = vector.broadcast %cst_55 : f32 to vector<1x1xf32>
      %114 = arith.subf %112, %113 : vector<1x1xf32>
      %115 = arith.subf %111, %99 : vector<1x256xf32>
      %cst_56 = arith.constant 0.000000e+00 : f32
      %116 = vector.broadcast %cst_56 : f32 to vector<1x256xf32>
      %117 = arith.select %98, %115, %116 : vector<1x256xi1>, vector<1x256xf32>
      %cst_57 = arith.constant dense<0.000000e+00> : vector<1xf32>
      %118 = vector.multi_reduction <add>, %117, %cst_57 [1] : vector<1x256xf32> to vector<1xf32>
      %119 = vector.shape_cast %118 : vector<1xf32> to vector<1x1xf32>
      %cst_58 = arith.constant 6.250000e-02 : f32
      %120 = vector.broadcast %cst_58 : f32 to vector<1x1xf32>
      %121 = arith.mulf %114, %120 : vector<1x1xf32>
      %cst_59 = arith.constant 3.125000e-02 : f32
      %122 = vector.broadcast %cst_59 : f32 to vector<1x1xf32>
      %123 = arith.mulf %119, %122 : vector<1x1xf32>
      %124 = arith.addf %121, %123 : vector<1x1xf32>
      %cst_60 = arith.constant 5.000000e-01 : f32
      %125 = vector.broadcast %cst_60 : f32 to vector<1x1xf32>
      %126 = arith.mulf %125, %124 : vector<1x1xf32>
      %c0_61 = arith.constant 0 : index
      %c0_62 = arith.constant 0 : index
      %127 = vector.load %arg4[%c0_61, %c0_62] : memref<1x1xf32, #tpu.memory_space<vmem>>, vector<1x1xf32>
      tpu.vector_store %arg4[%c0_61, %c0_62], %126 {strides = array<i32>} : memref<1x1xf32, #tpu.memory_space<vmem>>, vector<1x1xf32>,
    } else {
    }
    return
  }
  func.func @transform_0(%arg0: i32) -> (i32, i32) {
    %c0_i32 = arith.constant 0 : i32
    %c0_i32_0 = arith.constant 0 : i32
    return %arg0, %c0_i32 : i32, i32
  }
  func.func @transform_1(%arg0: i32) -> (i32, i32) {
    %c0_i32 = arith.constant 0 : i32
    %c0_i32_0 = arith.constant 0 : i32
    return %arg0, %c0_i32 : i32, i32
  }
  func.func @transform_3(%arg0: i32) -> (i32, i32) {
    %c0_i32 = arith.constant 0 : i32
    %c0_i32_0 = arith.constant 0 : i32
    %c0_i32_1 = arith.constant 0 : i32
    return %c0_i32, %c0_i32_0 : i32, i32
  }
}

</mosaic_0001>

<bundles_post_ra>
// kernel: tpu_custom_call.1
= control target key start
LH: loop header
LB: loop body
LE: loop exit
PB: predicated region body
PF: predicated region fallthrough
CT: control target
= control target key end

     0   :  { %8 = vsyncpa [#allocation10], 0  ;;  %s603_s0 = inlined_call_operand.hbm [shape: f32[8,32], index: 0, kind: input, shape index: {}]   ;;  %s604_s1 = inlined_call_operand.hbm [shape: f32[8,32], index: 1, kind: input, shape index: {}]   ;;  %s605_s2 = inlined_call_operand.hbm [shape: bf16[32,256], index: 2, kind: input, shape index: {}]   ;;  %s606_s3 = inlined_call_operand.hbm [shape: f32[1,1], index: 3, kind: output, shape index: {}]  }
   0x1   :  { %9 = vsyncpa [#allocation13], 0 }
   0x2   :  { %10 = vsyncpa [#allocation11], 0  ;;  %s545_s12 = smov [#allocation9]   ;;  %s546_s14 = smov [#allocation12]  }
   0x3   :  { %s17_s13 = sshll.u32 %s545_s12, 4  ;;  %s27_s15 = sshll.u32 %s546_s14, 4  ;;  %s18_s13 = int_to_ptr.vmem [resolvable:$true] %s17_s13  ;;  %s28_s15 = int_to_ptr.vmem [resolvable:$true] %s27_s15 }
   0x4   :  { %s465_s16 = scalar_lea.vmem %s18_s13, 128  ;;  %p470_p1 = scmp.lt.s32.totalorder %s18_s13, %s18_s13 }
   0x5   :  { %p466_p0 = scmp.ne.s32.totalorder %s18_s13, %s465_s16  ;;  %p471_p2 = scmp.lt.s32.totalorder %s465_s16, %s465_s16 }
   0x7   :  { %p472_p3 = por %p471_p2, %p470_p1 }
   0x9   :  { %p473_p4 = pnand %p472_p3, %p466_p0 }
   0xb   :  { %476 = shalt.err (!%p473_p4)
}
   0xc   :  { %20 = dma.hbm_to_vmem [thread:$0]  %s603_s0, 128, %s18_s13, [#allocation10]  }
   0xd   :  { %s485_s19 = scalar_lea.vmem %s28_s15, 128  ;;  %p490_p6 = scmp.lt.s32.totalorder %s28_s15, %s28_s15 }
   0xe   :  { %p486_p5 = scmp.ne.s32.totalorder %s28_s15, %s485_s19  ;;  %p491_p7 = scmp.lt.s32.totalorder %s485_s19, %s485_s19 }
  0x10   :  { %p492_p8 = por %p491_p7, %p490_p6 }
  0x12   :  { %p493_p9 = pnand %p492_p8, %p486_p5 }
  0x14   :  { %496 = shalt.err (!%p493_p9)
}
  0x15   :  { %30 = dma.hbm_to_vmem [thread:$0]  %s604_s1, 128, %s28_s15, [#allocation13]  }
  0x16   :  { %537 = dma.done.wait [#allocation10], 128  }
  0x17   :  { %538 = vsyncadd [#allocation10], 4294967168 }
  0x18   :  { %539 = dma.done.wait [#allocation13], 128  }
  0x19   :  { %540 = vsyncadd [#allocation13], 4294967168  ;;  %s547_s22 = smov [#allocation2]  }
  0x1a   :  { %s49_s23 = sshll.u32 %s547_s22, 4  ;;  %s50_s23 = int_to_ptr.vmem [resolvable:$true] %s49_s23 }
  0x1b   :  { %s505_s24 = scalar_lea.vmem %s50_s23, 512  ;;  %p510_p11 = scmp.lt.s32.totalorder %s50_s23, %s50_s23 }
  0x1c   :  { %p506_p10 = scmp.ne.s32.totalorder %s50_s23, %s505_s24  ;;  %p511_p12 = scmp.lt.s32.totalorder %s505_s24, %s505_s24 }
  0x1e   :  { %p512_p13 = por %p511_p12, %p510_p11 }
  0x20   :  { %p513_p0 = pnand %p512_p13, %p506_p10 }
  0x22   :  { %516 = shalt.err (!%p513_p0)  }
  0x23   :  { %52 = dma.hbm_to_vmem [thread:$0]  %s605_s2, 512, %s50_s23, [#allocation8] }
  0x24   :  { %541 = dma.done.wait [#allocation8], 512 }
  0x25   :  { %542 = vsyncadd [#allocation8], 4294966784  ;;  %v99_v0 = vld [vmem:[#allocation9] sm:$0xff]  ;;  %vm101_vm0 = vcmask 261120   ;;  %v116_v1 = vld [vmem:[#allocation12] sm:$0xff]  ;;  %v548_v10 = vmov 0   ;;  %v87_v61 = vlaneseq }
  0x26   :  { %v100_v2 = vmul.f32 %v99_v0, %v99_v0  ;;  %v117_v3 = vmul.f32 %v116_v1, %v116_v1  ;;  %v424_v6 = vld [vmem:[#allocation2 + $0x14] ss:$8 sps:$4 sm:$0xff]   ;;  %v426_v7 = vld [vmem:[#allocation2 + $0x10] ss:$8 sps:$4 sm:$0xff]   ;;  %v427_v8 = vld [vmem:[#allocation2 + $0x4] ss:$8 sps:$4 sm:$0xff]   ;;  %210 = vmatprep.mubr.bf16.mxu0 %v548_v10 }
  0x27   :  { %190 = vmatprep.subr.bf16.mxu0 %v424_v6  ;;  %v429_v9 = vld [vmem:[#allocation2] ss:$8 sps:$4 sm:$0xff]   ;;  %vm139_vm5 = vcmask 257024   ;;  %v59_v42 = vld [vmem:[#allocation2 + $0x10] sm:$0xff]   ;;  %v60_v47 = vld [vmem:[#allocation2 + $0x18] sm:$0xff]   ;;  %vm89_vm6 = vcmp.lt.s32.totalorder %v87_v61, 128 }
  0x28   :  { %v102_v4 = vsel %vm101_vm0, %v100_v2, 0.0  ;;  %v118_v5 = vsel %vm101_vm0, %v117_v3, 0.0  ;;  %191 = vmatpush1.bf16.msra.mxu0 %v426_v7  ;;  %v57_v36 = vld [vmem:[#allocation2] sm:$0xff]   ;;  %v58_v37 = vld [vmem:[#allocation2 + $0x8] sm:$0xff]   ;;  %v63_v43 = vunpack.c.l.bf16 %v59_v42  ;;  %v71_v44 = vunpack.c.h.bf16 %v59_v42  ;;  %s551_s1 = smov [#allocation14]  }
  0x29   :  { %103 = vadd.xlane.f32.xlu0 %v102_v4  ;;  %192 = vmatprep.subr.bf16.mxu0 %v427_v8  ;;  %v61_v38 = vunpack.c.l.bf16 %v57_v36  ;;  %v62_v39 = vunpack.c.l.bf16 %v58_v37  ;;  %v69_v40 = vunpack.c.h.bf16 %v57_v36  ;;  %v70_v41 = vunpack.c.h.bf16 %v58_v37  ;;  %s385_s2 = sshll.u32 %s551_s1, 4  ;;  %s386_s2 = int_to_ptr.vmem [resolvable:$true] %s385_s2 }
  0x2a   :  { %v64_v48 = vunpack.c.l.bf16 %v60_v47  ;;  %v72_v49 = vunpack.c.h.bf16 %v60_v47  ;;  %v75_v50 = vmul.f32 %v71_v44, %v63_v43  ;;  %vm587_vm7 = vcmp.lt.s32.totalorder %v87_v61, 256  ;;  %s517_s26 = scalar_lea.vmem %s386_s2, 16  ;;  %s521_s27 = scalar_lea.vmem %s386_s2, 32 }
  0x2b   :  { %v73_v45 = vmul.f32 %v69_v40, %v61_v38  ;;  %v74_v46 = vmul.f32 %v70_v41, %v62_v39  ;;  %vm97_vm8 = vcmask 0   ;;  %vm368_vm11 = vcmask 1040384   ;;  %p518_p1 = scmp.ne.s32.totalorder %s386_s2, %s517_s26  ;;  %p522_p2 = scmp.lt.s32.totalorder %s386_s2, %s386_s2 }
  0x2c   :  { %193 = vmatpush1.bf16.msra.mxu0 %v429_v9  ;;  %v76_v52 = vmul.f32 %v72_v49, %v64_v48  ;;  %p523_p3 = scmp.lt.s32.totalorder %s521_s27, %s517_s26 }
  0x2d   :  { %119 = vadd.xlane.f32.xlu0 %v118_v5  ;;  %v77_v51 = vadd.f32 %v74_v46, %v73_v45 }
  0x2e   :  { %p524_p4 = por %p523_p3, %p522_p2 }
  0x2f   :  { %v78_v53 = vadd.f32 %v77_v51, %v75_v50  ;;  %v315_v50 = vand.u32 127, %v87_v61 }
  0x30   :  { %p525_p5 = pnand %p524_p4, %p518_p1 }
  0x31   :  { %v79_v54 = vadd.f32 %v78_v53, %v76_v52  ;;  %v316_v51 = vadd.s32 128, %v315_v50  ;;  %vm341_vm9 = vcmp.lt.s32.totalorder %v315_v50, 16 }
  0x33   :  { %v80_v55 = vrot.slane %v79_v54, 4 }
  0x35   :  { %v81_v56 = vadd.f32 %v80_v55, %v79_v54  ;;  %v328_v54 = vand.u32 127, %v316_v51 }
  0x37   :  { %v82_v57 = vrot.slane %v81_v56, 2  ;;  %vm342_vm10 = vcmp.lt.s32.totalorder %v328_v54, 16 }
  0x39   :  { %v83_v58 = vadd.f32 %v82_v57, %v81_v56 }
  0x3b   :  { %v84_v59 = vrot.slane %v83_v58, 1 }
  0x3d   :  { %v85_v60 = vadd.f32 %v84_v59, %v83_v58 }
  0x3f   :  { %v86_v62 = vmul.f32 10.0, %v85_v60 }
  0x41   :  { %91 = vst.msk [vmem:[#allocation4] sm:$0x1] %vm89_vm6, %v86_v62  ;;  %92 = vst.msk [vmem:[#allocation4 + $0x1] sm:$0x1] %vm89_vm6, %v86_v62 }
  0xb2   :  { %v104_v11 = vpop.xlane.xlu0 %103 }
  0xb3   :  { %431 = vrsqrt.f32 %v104_v11  ;;  %vm107_vm1 = vcmp.eq.f32.partialorder %v104_v11, inf  ;;  %v110_v15 = vand.u32 2147483648, %v104_v11  ;;  %vm109_vm2 = vcmp.eq.f32.partialorder %v104_v11, 0.0 }
  0xb6   :  { %v120_v12 = vpop.xlane.xlu0 %119 }
  0xb7   :  { %433 = vrsqrt.f32 %v120_v12  ;;  %vm123_vm3 = vcmp.eq.f32.partialorder %v120_v12, inf  ;;  %v126_v21 = vand.u32 2147483648, %v120_v12  ;;  %vm125_vm4 = vcmp.eq.f32.partialorder %v120_v12, 0.0 }
  0xc0   :  { %v432_v13 = vpop.eup %431 }
  0xc1   :  { %v106_v14 = vmul.f32 %v432_v13, %v104_v11 }
  0xc3   :  { %v108_v16 = vsel %vm107_vm1, %v104_v11, %v106_v14 }
  0xc4   :  { %v434_v17 = vpop.eup %433  ;;  %v111_v18 = vsel %vm109_vm2, %v110_v15, %v108_v16 }
  0xc5   :  { %v112_v19 = vmax.f32 %v111_v18, 1e-12  ;;  %v122_v20 = vmul.f32 %v434_v17, %v120_v12 }
  0xc7   :  { %435 = vrcp.f32 %v112_v19  ;;  %v124_v22 = vsel %vm123_vm3, %v120_v12, %v122_v20 }
  0xc8   :  { %v127_v23 = vsel %vm125_vm4, %v126_v21, %v124_v22 }
  0xc9   :  { %v128_v24 = vmax.f32 %v127_v23, 1e-12 }
  0xcb   :  { %437 = vrcp.f32 %v128_v24  ;;  %v550_v24 = vmov 1966171168  }
  0xd4   :  { %v436_v25 = vpop.eup %435 }
  0xd5   :  { %v115_v26 = vmul.f32 %v436_v25, %v99_v0  ;;  %v549_v0 = vmov 0.0   ;;  %v252_v25 = vunpack.c.l.s4 %v550_v24 }
  0xd6   :  { %95 = vst.msk [vmem:[#allocation5] sm:$0x3] %vm587_vm7, %v549_v0 }
  0xd7   :  { %v137_v27 = vmul.f32 10.0, %v115_v26  ;;  %98 = vst.msk [vmem:[#allocation7] sm:$0x1] %vm97_vm8, %v549_v0 }
  0xd8   :  { %v438_v28 = vpop.eup %437 }
  0xd9   :  { %v131_v29 = vmul.f32 %v438_v28, %v116_v1  ;;  %v138_v30 = vpack.c.bf16 %v137_v27, %v137_v27  ;;  %v343_v28 = vld [vmem:[#allocation4] sm:$0x3] }
  0xdb   :  { %v132_v31 = vmul.f32 %v131_v29, %v115_v26  ;;  %140 = vst.msk [vmem:[#allocation3] sm:$0xf] %vm139_vm5, %v138_v30  ;;  %v141_v32 = vmul.f32 10.0, %v131_v29 }
  0xdd   :  { %v133_v33 = vsel %vm101_vm0, %v132_v31, 0.0  ;;  %v142_v34 = vpack.c.bf16 %v141_v32, %v141_v32  ;;  %v253_v31 = vunpack.c.0.s8 %v252_v25  ;;  %v233_v43 = vld [vmem:[#allocation5] sm:$0x3] }
  0xde   :  { %134 = vadd.xlane.f32.xlu1 %v133_v33 }
  0xdf   :  { %143 = vst.msk [vmem:[#allocation3 + $0x4] sm:$0xf] %vm139_vm5, %v142_v34  ;;  %v255_v34 = vshrl.u32 %v87_v61, 7 }
  0xe1   :  { %v256_v39 = vsub.s32 %v253_v31, %v255_v34  ;;  %v358_v56 = vsub.s32 0, %v255_v34  ;;  %v362_v57 = vsub.s32 1, %v255_v34  ;;  %v307_v34 = vld [vmem:[#allocation7] sm:$0x1] }
  0xe6   :  { %v430_v35 = vld [vmem:[#allocation3] sm:$0xff]  }
  0xe7   :  { %406 = vmatmul.mubr.msk.bf16.vlgmr.msra.gmra.mxu0 %vm101_vm0, %v430_v35  ;;  %v414_v35 = vadd.f32 -10.0, %v343_v28 }
  0xe9   :  { %v347_v40 = vmul.f32 1.442695, %v414_v35 }
 0x167   :  { %v135_v0 = vpop.xlane.xlu1 %134 }
 0x1a7   :  { %v212_v1 = vpop.f32.mrf.mxu0 }
 0x1a8   :  { %v407_v2 = vadd.f32 -10.0, %v212_v1 }
 0x1a9   :  { %v214_v3 = vpop.f32.mrf.mxu0 }
 0x1aa   :  { %v225_v4 = vmul.f32 1.442695, %v407_v2  ;;  %v408_v5 = vadd.f32 -10.0, %v214_v3  ;;  %v136_v3 = vmul.f32 10.0, %v135_v0 }
 0x1ab   :  { %v216_v6 = vpop.f32.mrf.mxu0 }
 0x1ac   :  { %v227_v7 = vmul.f32 1.442695, %v408_v5  ;;  %v409_v8 = vadd.f32 -10.0, %v216_v6  ;;  %439 = vpow2.f32 %v225_v4  ;;  %v413_v4 = vadd.f32 -10.0, %v136_v3 }
 0x1ad   :  { %v218_v9 = vpop.f32.mrf.mxu0 }
 0x1ae   :  { %441 = vpow2.f32 %v227_v7  ;;  %v229_v10 = vmul.f32 1.442695, %v409_v8  ;;  %v410_v11 = vadd.f32 -10.0, %v218_v9  ;;  %v283_v5 = vmul.f32 1.442695, %v413_v4 }
 0x1b0   :  { %443 = vpow2.f32 %v229_v10  ;;  %v231_v12 = vmul.f32 1.442695, %v410_v11 }
 0x1b2   :  { %445 = vpow2.f32 %v231_v12 }
 0x1b3   :  { %447 = vpow2.f32 %v347_v40 }
 0x1b9   :  { %v440_v13 = vpop.eup %439 }
 0x1bb   :  { %v442_v14 = vpop.eup %441 }
 0x1bc   :  { %v272_v15 = vadd.f32 %v442_v14, %v440_v13 }
 0x1bd   :  { %v444_v16 = vpop.eup %443 }
 0x1be   :  { %v234_v17 = vadd.f32 %v444_v16, %v440_v13  ;;  %273 = vadd.xlane.f32.xlu1 %v272_v15  ;;  %v298_v15 = vrot.slane %v136_v3, 4 }
 0x1bf   :  { %v446_v18 = vpop.eup %445 }
 0x1c0   :  { %v235_v19 = vrot.slane %v234_v17, 4  ;;  %v241_v20 = vadd.f32 %v446_v18, %v442_v14  ;;  %v275_v21 = vadd.f32 %v446_v18, %v444_v16  ;;  %v448_v46 = vpop.eup %447  ;;  %v299_v16 = vadd.f32 %v298_v15, %v136_v3 }
 0x1c2   :  { %v236_v22 = vadd.f32 %v235_v19, %v234_v17  ;;  %v242_v23 = vrot.slane %v241_v20, 4  ;;  %276 = vadd.xlane.f32.xlu0 %v275_v21  ;;  %v300_v18 = vrot.slane %v299_v16, 2 }
 0x1c4   :  { %v237_v26 = vrot.slane %v236_v22, 2  ;;  %v243_v27 = vadd.f32 %v242_v23, %v241_v20 }
 0x1c6   :  { %v238_v29 = vadd.f32 %v237_v26, %v236_v22  ;;  %v244_v30 = vrot.slane %v243_v27, 2  ;;  %v301_v22 = vadd.f32 %v300_v18, %v299_v16 }
 0x1c8   :  { %v239_v32 = vrot.slane %v238_v29, 1  ;;  %v245_v33 = vadd.f32 %v244_v30, %v243_v27  ;;  %v302_v25 = vrot.slane %v301_v22, 1 }
 0x1ca   :  { %v246_v36 = vrot.slane %v245_v33, 1  ;;  %v240_v37 = vadd.f32 %v239_v32, %v238_v29 }
 0x1cc   :  { %v247_v38 = vadd.f32 %v246_v36, %v245_v33 }
 0x1ce   :  { %v250_v41 = vcombine.low %v240_v37, %v247_v38 }
 0x1d0   :  { %v257_v42 = vrot.slane %v250_v41, %v256_v39 }
 0x1d2   :  { %v264_v44 = vrot.slane %v257_v42, %v256_v39 }
 0x1d4   :  { %v266_v45 = vadd.f32 %v264_v44, %v233_v43 }
 0x1d6   :  { %271 = vst.msk [vmem:[#allocation5] sm:$0x3] %vm587_vm7, %v266_v45 }
 0x1dd   :  { %v344_v47 = vld [vmem:[#allocation5] sm:$0x3] }
 0x1de   :  { %v345_v48 = vmax.f32 %v344_v47, 0.0 }
 0x1e0   :  { %v349_v49 = vadd.f32 %v448_v46, %v345_v48 }
 0x1e2   :  { %449 = vlog2.f32 %v349_v49 }
 0x1e3   :  { %451 = vpow2.f32 %v283_v5 }
 0x1ef   :  { %v450_v52 = vpop.eup %449 }
 0x1f0   :  { %v351_v53 = vmul.f32 0.6931472, %v450_v52  ;;  %v452_v9 = vpop.eup %451 }
 0x1f2   :  { %v352_v55 = vadd.f32 10.0, %v351_v53 }
 0x1f4   :  { %v354_v58 = vsub.f32 %v352_v55, %v343_v28  ;;  %v303_v28 = vadd.f32 %v302_v25, %v301_v22 }
 0x1f6   :  { %v359_v59 = vrot.slane %v354_v58, %v358_v56  ;;  %v363_v60 = vrot.slane %v354_v58, %v362_v57  ;;  %v304_v31 = vmul.f32 2.0, %v303_v28 }
 0x1f8   :  { %v366_v62 = vsel %vm341_vm9, %v359_v59, 0.0  ;;  %v367_v63 = vsel %vm342_vm10, %v363_v60, 0.0 }
 0x1f9   :  { %v369_v1 = vsel %vm368_vm11, %v366_v62, 0.0  ;;  %v370_v61 = vsel %vm368_vm11, %v367_v63, 0.0 }
 0x1fa   :  { %v371_v2 = vadd.f32 %v370_v61, %v369_v1 }
 0x1fc   :  { %372 = vadd.xlane.f32.xlu1 %v371_v2 }
 0x247   :  { %v274_v6 = vpop.xlane.xlu1 %273 }
 0x248   :  { %v411_v7 = vadd.f32 -0.010169584, %v274_v6 }
 0x24a   :  { %v280_v8 = vmax.f32 %v411_v7, 0.0 }
 0x24b   :  { %v277_v10 = vpop.xlane.xlu0 %276 }
 0x24c   :  { %v285_v11 = vadd.f32 %v452_v9, %v280_v8  ;;  %v412_v12 = vadd.f32 -0.010169584, %v277_v10 }
 0x24e   :  { %v281_v13 = vmax.f32 %v412_v12, 0.0  ;;  %453 = vlog2.f32 %v285_v11 }
 0x250   :  { %v288_v14 = vadd.f32 %v452_v9, %v281_v13 }
 0x252   :  { %455 = vlog2.f32 %v288_v14 }
 0x25b   :  { %v454_v17 = vpop.eup %453 }
 0x25c   :  { %v287_v20 = vmul.f32 0.6931472, %v454_v17 }
 0x25f   :  { %v456_v19 = vpop.eup %455 }
 0x260   :  { %v290_v21 = vmul.f32 0.6931472, %v456_v19 }
 0x262   :  { %v291_v23 = vadd.f32 %v290_v21, %v287_v20 }
 0x264   :  { %v292_v24 = vrot.slane %v291_v23, 4 }
 0x266   :  { %v293_v26 = vadd.f32 %v292_v24, %v291_v23 }
 0x268   :  { %v294_v27 = vrot.slane %v293_v26, 2 }
 0x26a   :  { %v295_v29 = vadd.f32 %v294_v27, %v293_v26 }
 0x26c   :  { %v296_v30 = vrot.slane %v295_v29, 1 }
 0x26e   :  { %v297_v32 = vadd.f32 %v296_v30, %v295_v29 }
 0x270   :  { %v305_v33 = vsub.f32 %v297_v32, %v304_v31 }
 0x272   :  { %v306_v35 = vadd.f32 160.0, %v305_v33 }
 0x274   :  { %v308_v36 = vadd.f32 %v307_v34, %v306_v35 }
 0x276   :  { %310 = vst.msk [vmem:[#allocation7] sm:$0x1] %vm97_vm8, %v308_v36 }
 0x27d   :  { %v353_v37 = vld [vmem:[#allocation7] sm:$0x1] }
 0x27e   :  { %v374_v39 = vmul.f32 0.0625, %v353_v37 }
 0x285   :  { %v373_v38 = vpop.xlane.xlu1 %372 }
 0x286   :  { %v375_v40 = vmul.f32 0.03125, %v373_v38 }
 0x288   :  { %v376_v41 = vadd.f32 %v375_v40, %v374_v39 }
 0x28a   :  { %v377_v42 = vmul.f32 0.5, %v376_v41 }
 0x28c   :  { %378 = vst.msk [vmem:[#allocation14] sm:$0x1] %vm97_vm8, %v377_v42 }
 0x28d   :  { %528 = shalt.err (!%p525_p5)
}
 0x28e   :  { %388 = dma.vmem_to_hbm [thread:$0]  %s386_s2, 16, %s606_s3, [#allocation11]  }
 0x28f   :  { %543 = dma.done.wait [#allocation11], 16  }
 0x290   :  { %544 = vsyncadd [#allocation11], 4294967280 }
 0x291   :  { %392 = vsyncpa [#allocation10], 1 }
 0x292   :  { %393 = vsyncpa [#allocation13], 1 }
 0x293   :  { %394 = vsyncpa [#allocation11], 1 }
 0x294   :  { %395 = vsyncmov [#allocation8] }
 0x297   :  { %s396_s30 = vpop.sfrf %395 }
 0x298   :  { %p415_p6 = scmp.ne.s32.totalorder %s396_s30, 0 }
 0x29a   :  { %400 = shalt.err (%p415_p6)  }

</bundles_post_ra>
